<compile_context>
chip_gen: v6e
topology: v6e:2x2x1
jax: 0.10.0
libtpu: 0.0.40
codegen_flags: <defaults>
</compile_context>

<pallas_src>
import functools

import jax
import jax.numpy as jnp
from jax import lax
from jax.experimental import pallas as pl
from jax.experimental.pallas import tpu as pltpu

F32 = jnp.float32
BF16 = jnp.bfloat16
VMEM = pltpu.MemorySpace.VMEM
SMEM = pltpu.MemorySpace.SMEM


def _bf(a):
    return a.astype(BF16)


def _batchnorm_train(h, gamma, beta):
    """BatchNorm1d training-mode stats; centered two-pass variance (no E[x^2]-E[x]^2 cancellation)."""
    mean = jnp.mean(h, axis=0, keepdims=True)
    hc = h - mean
    var = jnp.mean(hc * hc, axis=0, keepdims=True)
    return hc * lax.rsqrt(var + 1e-5) * gamma + beta


# ----------------------------------------------------------------------------- fused multi-layer GIN GNN

def _gnn_kernel(h0_ref, a_ref, t_ref, ee_ref, w1_ref, b1_ref, w2_ref, b2_ref,
                gm_ref, bt_ref, o_ref, *, num_layers):
    # A, T and all layer params stay resident in VMEM for every layer and both passes.
    a = a_ref[...]                                               # (N, N) bf16
    t = t_ref[...]                                               # (N, E) bf16
    h = h0_ref[0]                                                # (N, D) f32
    for l in range(num_layers):
        # GIN aggregation with self loops: A @ h + T @ e_emb_l  (== [A|T] @ [h ; e_emb_l])
        aggr = (jnp.dot(a, h.astype(BF16), preferred_element_type=jnp.float32)
                + jnp.dot(t, ee_ref[l], preferred_element_type=jnp.float32))
        z = jnp.dot(aggr.astype(BF16), w1_ref[l], preferred_element_type=jnp.float32) + b1_ref[l]
        z = jnp.maximum(z, 0.0)
        z = jnp.dot(z.astype(BF16), w2_ref[l], preferred_element_type=jnp.float32) + b2_ref[l]
        z = _batchnorm_train(z, gm_ref[l], bt_ref[l])
        if l != num_layers - 1:
            z = jnp.maximum(z, 0.0)
        h = z
    o_ref[0] = h


def pallas_gnn_both(gp, x_atoms, masked_x_atoms, A, T, ea):
    """Runs the normal and attribute-masked GNN passes in one kernel (grid axis of 2, 'parallel')."""
    # TODO(synk): for production-size graphs (N in the thousands) tile the aggregation (rows of A as
    #             'parallel' blocks, N+E as an 'arbitrary' K axis with a VMEM accumulator) so AT fits
    #             v7x's 64 MiB VMEM and gets real pipelining.
    N = A.shape[0]
    E2 = T.shape[1]
    D = gp['atom_emb1'].shape[1]
    L = len(gp['layers'])

    h0_a = gp['atom_emb1'][x_atoms[:, 0]] + gp['atom_emb2'][x_atoms[:, 1]]
    h0_b = gp['atom_emb1'][masked_x_atoms[:, 0]] + gp['atom_emb2'][masked_x_atoms[:, 1]]
    h0 = jnp.stack([h0_a, h0_b], axis=0).astype(F32)             # (2, N, D)

    ee = jnp.stack([lp['edge_emb1'][ea[:, 0]] + lp['edge_emb2'][ea[:, 1]]
                    for lp in gp['layers']], axis=0).astype(BF16)        # (L, E2, D)
    w1 = _bf(jnp.stack([lp['w1'] for lp in gp['layers']], axis=0))       # (L, D, 2D)
    b1 = jnp.stack([lp['b1'] for lp in gp['layers']], axis=0)            # (L, 1, 2D)
    w2 = _bf(jnp.stack([lp['w2'] for lp in gp['layers']], axis=0))       # (L, 2D, D)
    b2 = jnp.stack([lp['b2'] for lp in gp['layers']], axis=0)            # (L, 1, D)
    gm = jnp.stack([lp['gamma'] for lp in gp['layers']], axis=0)         # (L, 1, D)
    bt = jnp.stack([lp['beta'] for lp in gp['layers']], axis=0)          # (L, 1, D)

    out = pl.pallas_call(
        functools.partial(_gnn_kernel, num_layers=L),
        out_shape=jax.ShapeDtypeStruct((2, N, D), F32),
        grid=(2,),
        in_specs=[
            pl.BlockSpec((1, N, D), lambda p: (p, 0, 0)),
            pl.BlockSpec((N, N), lambda p: (0, 0)),
            pl.BlockSpec((N, E2), lambda p: (0, 0)),
            pl.BlockSpec((L, E2, D), lambda p: (0, 0, 0)),
            pl.BlockSpec((L, D, 2 * D), lambda p: (0, 0, 0)),
            pl.BlockSpec((L, 1, 2 * D), lambda p: (0, 0, 0)),
            pl.BlockSpec((L, 2 * D, D), lambda p: (0, 0, 0)),
            pl.BlockSpec((L, 1, D), lambda p: (0, 0, 0)),
            pl.BlockSpec((L, 1, D), lambda p: (0, 0, 0)),
            pl.BlockSpec((L, 1, D), lambda p: (0, 0, 0)),
        ],
        out_specs=pl.BlockSpec((1, N, D), lambda p: (p, 0, 0)),
        compiler_params=pltpu.CompilerParams(
            dimension_semantics=("parallel",),
            vmem_limit_bytes=64 * 1024 * 1024),
    )(h0, A, T, ee, w1, b1, w2, b2, gm, bt)
    return out[0], out[1]


# ----------------------------------------------------------------------------- CNN (conv + pool + head)

def _cnn_kernel(p_ref, cw_ref, cb_ref, hw_ref, hb_ref, o_ref):
    TB, HW, K = p_ref.shape
    patches = p_ref[...].reshape(TB * HW, K)                     # bf16, one fat conv matmul
    h = jnp.dot(patches, cw_ref[...], preferred_element_type=jnp.float32) + cb_ref[...]
    h = jnp.maximum(h, 0.0)                                      # ReLU fused
    # per-image global average pool (TB static, small -> TB sublane reductions)
    pooled = jnp.concatenate(
        [jnp.mean(h[i * HW:(i + 1) * HW, :], axis=0, keepdims=True) for i in range(TB)], axis=0)
    o_ref[...] = jnp.dot(pooled.astype(BF16), hw_ref[...],
                         preferred_element_type=jnp.float32) + hb_ref[...]   # (TB, D) lane-dense block


def pallas_cnn(patches, cp):
    """patches: (B, H*W, 9*C) bf16. Returns (B, emb_dim). TB images per grid step, pipelined."""
    B, HW, K = patches.shape
    TB = 8 if B % 8 == 0 else B                                  # batch images per grid step
    conv_w = _bf(cp['conv_w'])
    head_w = _bf(cp['head_w'])
    CC = conv_w.shape[1]
    D = head_w.shape[1]
    # TODO(synk): if patch DMA still gates the loop on v5e, set pipeline_mode=pl.Buffered(3) on in_specs[0].
    return pl.pallas_call(
        _cnn_kernel,
        out_shape=jax.ShapeDtypeStruct((B, D), F32),
        grid=(B // TB,),
        in_specs=[
            pl.BlockSpec((TB, HW, K), lambda b: (b, 0, 0)),
            pl.BlockSpec((K, CC), lambda b: (0, 0)),
            pl.BlockSpec((1, CC), lambda b: (0, 0)),
            pl.BlockSpec((CC, D), lambda b: (0, 0)),
            pl.BlockSpec((1, D), lambda b: (0, 0)),
        ],
        out_specs=pl.BlockSpec((TB, D), lambda b: (b, 0)),
        compiler_params=pltpu.CompilerParams(
            dimension_semantics=("parallel",),
            vmem_limit_bytes=64 * 1024 * 1024),
    )(patches, conv_w, cp['conv_b'], head_w, cp['head_b'])


# ----------------------------------------------------------------------------- fused heads:
# projection heads + InfoNCE + VAE pair (GIM) + cdist softmax negative-sampling weights

def _fused_heads_kernel(g_ref, i_ref, e1_ref, e2_ref,
                        p1w1, p1b1, p1gm, p1bt, p1w2, p1b2,
                        p2w1, p2b1, p2gm, p2bt, p2w2, p2b2,
                        a_wmu, a_bmu, a_wvar, a_bvar, a_dw1, a_db1, a_dgm, a_dbt, a_dw2, a_db2,
                        b_wmu, b_bmu, b_wvar, b_bvar, b_dw1, b_db1, b_dgm, b_dbt, b_dw2, b_db2,
                        go_ref, io_ref, gic_ref, gim_ref, g2i_ref, i2g_ref,
                        *, temperature, beta):
    # TODO(synk): pad D / 2D lane dims to 128 multiples for production configs (MXU >=75% idle at D=32).

    def proj_head(x, w1, b1, gm, bt, w2, b2):
        h = jnp.dot(x.astype(BF16), w1[...], preferred_element_type=jnp.float32) + b1[...]
        h = jnp.where(h >= 0.0, h, 0.01 * h)                     # LeakyReLU(0.01)
        h = _batchnorm_train(h, gm[...], bt[...])
        return jnp.dot(h.astype(BF16), w2[...], preferred_element_type=jnp.float32) + b2[...]

    g = proj_head(g_ref[...], p1w1, p1b1, p1gm, p1bt, p1w2, p1b2)
    im = proj_head(i_ref[...], p2w1, p2b1, p2gm, p2bt, p2w2, p2b2)
    go_ref[...] = g
    io_ref[...] = im

    # ---- normalized symmetric InfoNCE; one logits matmul, positives as f32 elementwise dot.
    gn = g * lax.rsqrt(jnp.sum(g * g, axis=-1, keepdims=True) + 1e-12)
    imn = im * lax.rsqrt(jnp.sum(im * im, axis=-1, keepdims=True) + 1e-12)
    dn = (((1,), (1,)), ((), ()))
    logits = lax.dot_general(gn.astype(BF16), imn.astype(BF16), dn,
                             preferred_element_type=jnp.float32) / temperature
    pos = jnp.sum(gn * imn, axis=-1, keepdims=True) / temperature           # (B,1) f32, no mask needed
    m_row = jnp.max(logits, axis=-1, keepdims=True)
    lse_row = m_row + jnp.log(jnp.sum(jnp.exp(logits - m_row), axis=-1, keepdims=True))
    m_col = jnp.max(logits, axis=0, keepdims=True)
    lse_col = m_col + jnp.log(jnp.sum(jnp.exp(logits - m_col), axis=0, keepdims=True))
    # TODO(synk): for contrastive B >= ~1024, convert to a tiled/online LSE to stay inside v7x VMEM.
    gic_ref[0, 0] = 0.5 * (jnp.mean(lse_row) + jnp.mean(lse_col)) - jnp.mean(pos)

    # ---- fused VAE pair (GIM loss): enc -> reparam -> dec -> BN -> ReLU -> dec, recon + beta*KL
    def vae_loss(x, y, eps, wmu, bmu, wvar, bvar, dw1, db1, dgm, dbt, dw2, db2):
        xb = x.astype(BF16)
        mu = jnp.dot(xb, wmu[...], preferred_element_type=jnp.float32) + bmu[...]
        log_var = jnp.dot(xb, wvar[...], preferred_element_type=jnp.float32) + bvar[...]
        z = mu + jnp.exp(0.5 * log_var) * eps
        h = jnp.dot(z.astype(BF16), dw1[...], preferred_element_type=jnp.float32) + db1[...]
        h = jnp.maximum(_batchnorm_train(h, dgm[...], dbt[...]), 0.0)
        y_hat = jnp.dot(h.astype(BF16), dw2[...], preferred_element_type=jnp.float32) + db2[...]
        recon = jnp.mean((y_hat - y) ** 2)
        kl = -0.5 * jnp.mean(jnp.sum(1.0 + log_var - mu * mu - jnp.exp(log_var),
                                     axis=1, keepdims=True))
        return recon + beta * kl

    l_img = vae_loss(g, im, e1_ref[...],
                     a_wmu, a_bmu, a_wvar, a_bvar, a_dw1, a_db1, a_dgm, a_dbt, a_dw2, a_db2)
    l_graph = vae_loss(im, g, e2_ref[...],
                       b_wmu, b_bmu, b_wvar, b_bvar, b_dw1, b_db1, b_dgm, b_dbt, b_dw2, b_db2)
    gim_ref[0, 0] = 0.5 * (l_img + l_graph)

    # ---- no_grad block: one euclidean distance matrix, row softmax (g2i) + col softmax (i2g).
    xy = lax.dot_general(g, im, dn, preferred_element_type=jnp.float32)      # f32 (no bf16 cancellation)
    x2 = jnp.sum(g * g, axis=-1, keepdims=True)                              # (B, 1)
    y2 = jnp.sum(im * im, axis=-1, keepdims=True)                            # (B, 1)
    d = jnp.sqrt(jnp.maximum(x2 + jnp.transpose(y2) - 2.0 * xy, 0.0))        # d[i,j] = ||g_i - im_j||
    B = g.shape[0]
    row = lax.broadcasted_iota(jnp.int32, (B, B), 0)
    col = lax.broadcasted_iota(jnp.int32, (B, B), 1)
    off_diag = row != col

    # g2i = softmax(cdist(g, im), dim=1); diagonal zeroed after normalization (PyTorch semantics).
    m1 = jnp.max(d, axis=-1, keepdims=True)
    ex1 = jnp.exp(d - m1)
    g2i = ex1 / jnp.sum(ex1, axis=-1, keepdims=True)
    g2i_ref[...] = jnp.where(off_diag, g2i, 0.0)

    # i2g = softmax(cdist(im, g), dim=1) == column softmax of d; emitted UNTRANSPOSED
    # (consumer samples with categorical(axis=0)); avoids a BxB XLU transpose.
    m0 = jnp.max(d, axis=0, keepdims=True)
    ex0 = jnp.exp(d - m0)
    i2g_cols = ex0 / jnp.sum(ex0, axis=0, keepdims=True)
    i2g_ref[...] = jnp.where(off_diag, i2g_cols, 0.0)


def pallas_fused_heads(g, im, eps1, eps2, p1, p2, vp_img, vp_graph, temperature, beta):
    # TODO(synk): calc_contrastive_loss / VariationalAutoEncoder are external; standard symmetric
    #             InfoNCE with temperature and L2-recon + beta*KL used (detach_target only affects
    #             gradients, forward value unchanged).
    B, D = g.shape

    def proj_flat(p):
        return (_bf(p['w1']), p['b1'], p['gamma'], p['beta'], _bf(p['w2']), p['b2'])

    def vae_flat(vp):
        return (_bf(vp['w_mu']), vp['b_mu'], _bf(vp['w_var']), vp['b_var'],
                _bf(vp['dw1']), vp['db1'], vp['dgamma'], vp['dbeta'],
                _bf(vp['dw2']), vp['db2'])

    args = ((g.astype(F32), im.astype(F32), eps1, eps2)
            + proj_flat(p1) + proj_flat(p2) + vae_flat(vp_img) + vae_flat(vp_graph))

    g_out, i_out, gic, gim, g2i, i2g_cols = pl.pallas_call(
        functools.partial(_fused_heads_kernel, temperature=temperature, beta=beta),
        out_shape=(jax.ShapeDtypeStruct((B, D), F32),
                   jax.ShapeDtypeStruct((B, D), F32),
                   jax.ShapeDtypeStruct((1, 1), F32),
                   jax.ShapeDtypeStruct((1, 1), F32),
                   jax.ShapeDtypeStruct((B, B), F32),
                   jax.ShapeDtypeStruct((B, B), F32)),
        in_specs=[pl.BlockSpec(memory_space=VMEM)] * len(args),
        out_specs=(pl.BlockSpec(memory_space=VMEM),
                   pl.BlockSpec(memory_space=VMEM),
                   pl.BlockSpec(memory_space=SMEM),
                   pl.BlockSpec(memory_space=SMEM),
                   pl.BlockSpec(memory_space=VMEM),
                   pl.BlockSpec(memory_space=VMEM)),
        compiler_params=pltpu.CompilerParams(vmem_limit_bytes=64 * 1024 * 1024),
    )(*args)
    return g_out, i_out, gic[0, 0], gim[0, 0], g2i, i2g_cols


# ----------------------------------------------------------------------------- glue modules

def cross_entropy(logits, labels):
    m = jnp.max(logits, axis=-1, keepdims=True)
    lse = m + jnp.log(jnp.sum(jnp.exp(logits - m), axis=-1, keepdims=True))
    ll = jnp.take_along_axis(logits, labels[:, None].astype(jnp.int32), axis=1)
    return jnp.mean(lse - ll)


def build_graph_mats(edge_index, edge_attr, N):
    """Dense A (with self loops) + incidence T and augmented edge attrs; built once, shared by both passes."""
    self_idx = jnp.arange(N, dtype=edge_index.dtype)
    ei = jnp.concatenate([edge_index, jnp.stack([self_idx, self_idx], axis=0)], axis=1)
    sl_attr = jnp.stack([jnp.full((N,), 4, edge_attr.dtype),
                         jnp.zeros((N,), edge_attr.dtype)], axis=1)
    ea = jnp.concatenate([edge_attr, sl_attr], axis=0)
    src, tgt = ei[0], ei[1]
    E = ei.shape[1]
    A = jnp.zeros((N, N), F32).at[tgt, src].add(1.0)
    T = jnp.zeros((N, E), F32).at[tgt, jnp.arange(E)].add(1.0)
    return _bf(A), _bf(T), ea                                    # 0/1 exact in bf16


def global_mean_pool(node_repr, batch_vec, num_graphs):
    # tiny (B x N) matmul: cheaper as plain XLA than a pallas launch.
    one_hot = (batch_vec[None, :] == jnp.arange(num_graphs)[:, None]).astype(F32)
    counts = jnp.maximum(one_hot.sum(axis=1, keepdims=True), 1.0)
    return (one_hot @ node_repr) / counts


def cnn_forward(cp, img_nchw):
    # TODO(synk): real Cnn is a pretrained timm backbone; stand-in = 3x3 conv -> ReLU -> GAP -> Linear.
    # TODO(synk): for production image sizes, do the 3x3 conv as 9 shifted in-kernel dots over a padded
    #             (TB, H+2, W+2, C) block instead of materializing the 9x im2col expansion in HBM.
    x = _bf(jnp.transpose(img_nchw, (0, 2, 3, 1)))               # NCHW -> NHWC, streamed as bf16
    B, H, W, C = x.shape
    xp = jnp.pad(x, ((0, 0), (1, 1), (1, 1), (0, 0)))
    patches = []
    for dh in range(3):
        for dw in range(3):
            patches.append(xp[:, dh:dh + H, dw:dw + W, :])
    patches = jnp.concatenate(patches, axis=-1).reshape(B, H * W, 9 * C)     # (B, HW, 9C) bf16
    return pallas_cnn(patches, cp)                               # conv + ReLU + GAP + head fused


# ----------------------------------------------------------------------------- MIGA forward

def miga_forward(params, batch1, images_nchw, key, cfg):
    B = cfg['batch_size']
    N = batch1['x'].shape[0]

    A, T, ea = build_graph_mats(batch1['edge_index'], batch1['edge_attr'], N)

    # Both GNN passes (normal + masked, MGM_mode == 'AM') in one launch: A/T/weights resident once.
    node_repr, masked_node_repr = pallas_gnn_both(
        params['gnn'], batch1['x'], batch1['masked_x'], A, T, ea)

    molecule_graph_emb = global_mean_pool(node_repr, batch1['batch'], B)
    molecule_img_emb = cnn_forward(params['cnn'], images_nchw)

    k_vae1, k_vae2, k_neg1, k_neg2 = jax.random.split(key, 4)
    eps1 = jax.random.normal(k_vae1, molecule_graph_emb.shape, F32)
    eps2 = jax.random.normal(k_vae2, molecule_img_emb.shape, F32)

    # projection heads + symmetric InfoNCE + VAE pair + cdist softmaxes fused into a single kernel.
    (molecule_graph_emb, molecule_img_emb, GIC_loss, GIM_loss,
     weights_g2i, weights_i2g_cols) = pallas_fused_heads(
        molecule_graph_emb, molecule_img_emb, eps1, eps2,
        params['proj1'], params['proj2'], params['vae_img'], params['vae_graph'],
        cfg['T'], cfg['beta'])

    output_pos = jnp.concatenate([molecule_graph_emb, molecule_img_emb], axis=1)

    neg_img_idx = jax.random.categorical(k_neg1, jnp.log(weights_g2i + 1e-30), axis=-1)
    # i2g weights come back as the column softmax (untransposed): sample along axis 0.
    neg_graph_idx = jax.random.categorical(k_neg2, jnp.log(weights_i2g_cols + 1e-30), axis=0)
    molecule_img_embeds_neg = molecule_img_emb[neg_img_idx]
    molecule_graph_embeds_neg = molecule_graph_emb[neg_graph_idx]

    molecule_graph_embeds_all = jnp.concatenate([molecule_graph_emb, molecule_graph_embeds_neg], axis=0)
    molecule_img_embeds_all = jnp.concatenate([molecule_img_emb, molecule_img_embeds_neg], axis=0)
    output_neg = jnp.concatenate([molecule_graph_embeds_all, molecule_img_embeds_all], axis=1)

    vl_embeddings = jnp.concatenate([output_pos, output_neg], axis=0)        # (3B, 2D)
    # gim head output is 2-wide (lane-sparse): plain XLA matmul beats a pallas launch.
    vl_output = vl_embeddings @ params['gim_w'] + params['gim_b']
    gim_labels = jnp.concatenate([jnp.ones((B,), jnp.int32), jnp.zeros((2 * B,), jnp.int32)])
    GGIM_loss = GIM_loss + cross_entropy(vl_output, gim_labels)

    # MGM_mode == 'AM' (attribute masking); AM head is 119-wide -> XLA.
    masked_repr = masked_node_repr[batch1['masked_atom_indices']]
    node_pred = masked_repr @ params['am_w'] + params['am_b']
    MGM_loss = cross_entropy(node_pred, batch1['mask_node_label'][:, 0])

    return GIC_loss, GGIM_loss, MGM_loss


# ----------------------------------------------------------------------------- params / data

def init_params(key, D, L, n_ch, conv_ch, n_atom_classes=119):
    keys = iter(jax.random.split(key, 64))

    def w(shape, scale=0.1):
        return scale * jax.random.normal(next(keys), shape, F32)

    zeros = lambda s: jnp.zeros(s, F32)
    ones = lambda s: jnp.ones(s, F32)

    gnn = {
        'atom_emb1': w((120, D)),
        'atom_emb2': w((3, D)),
        'layers': [
            {'edge_emb1': w((6, D)), 'edge_emb2': w((3, D)),
             'w1': w((D, 2 * D)), 'b1': zeros((1, 2 * D)),
             'w2': w((2 * D, D)), 'b2': zeros((1, D)),
             'gamma': ones((1, D)), 'beta': zeros((1, D))}
            for _ in range(L)
        ],
    }

    def proj():
        return {'w1': w((D, D)), 'b1': zeros((1, D)), 'gamma': ones((1, D)),
                'beta': zeros((1, D)), 'w2': w((D, D)), 'b2': zeros((1, D))}

    def vae():
        return {'w_mu': w((D, D)), 'b_mu': zeros((1, D)),
                'w_var': w((D, D)), 'b_var': zeros((1, D)),
                'dw1': w((D, D)), 'db1': zeros((1, D)),
                'dgamma': ones((1, D)), 'dbeta': zeros((1, D)),
                'dw2': w((D, D)), 'db2': zeros((1, D))}

    cnn = {'conv_w': w((9 * n_ch, conv_ch)), 'conv_b': zeros((1, conv_ch)),
           'head_w': w((conv_ch, D)), 'head_b': zeros((1, D))}

    return {'gnn': gnn, 'proj1': proj(), 'proj2': proj(),
            'gim_w': w((2 * D, 2)), 'gim_b': zeros((1, 2)),
            'vae_img': vae(), 'vae_graph': vae(), 'cnn': cnn,
            'am_w': w((D, n_atom_classes)), 'am_b': zeros((1, n_atom_classes))}


if __name__ == "__main__":
    D = 32          # emb_dim
    L = 2           # num_layer
    B = 4           # graphs per batch / images per batch
    NODES_PER_G = 3
    N = B * NODES_PER_G
    N_CH = 5        # cDNA=False -> 5-channel images
    CONV_CH = 16
    cfg = {'batch_size': B, 'T': 0.1, 'beta': 1.0}

    root = jax.random.PRNGKey(0)
    k_param, k_atom, k_chir, k_bond, k_dir, k_img, k_fwd = jax.random.split(root, 7)

    params = init_params(k_param, D, L, N_CH, CONV_CH)

    # Graph batch (4 path graphs of 3 nodes each)
    atom_type = jax.random.randint(k_atom, (N,), 0, 119)
    chirality = jax.random.randint(k_chir, (N,), 0, 3)
    x = jnp.stack([atom_type, chirality], axis=1).astype(jnp.int32)

    srcs, tgts = [], []
    for g in range(B):
        b0 = g * NODES_PER_G
        for (s, t) in [(b0, b0 + 1), (b0 + 1, b0), (b0 + 1, b0 + 2), (b0 + 2, b0 + 1)]:
            srcs.append(s)
            tgts.append(t)
    edge_index = jnp.array([srcs, tgts], dtype=jnp.int32)             # (2, 16)
    E = edge_index.shape[1]
    bond_type = jax.random.randint(k_bond, (E,), 0, 4)
    bond_dir = jax.random.randint(k_dir, (E,), 0, 3)
    edge_attr = jnp.stack([bond_type, bond_dir], axis=1).astype(jnp.int32)

    masked_atom_indices = jnp.array([1, 4, 7, 10], dtype=jnp.int32)
    mask_node_label = x[masked_atom_indices]
    masked_x = x.at[masked_atom_indices, 0].set(119)                  # mask token

    batch1 = {'x': x, 'edge_index': edge_index, 'edge_attr': edge_attr,
              'batch': jnp.repeat(jnp.arange(B), NODES_PER_G),
              'masked_x': masked_x, 'masked_atom_indices': masked_atom_indices,
              'mask_node_label': mask_node_label}

    images = jax.random.normal(k_img, (B, N_CH, 16, 16), F32)         # NCHW, like PyTorch

    GIC_loss, GGIM_loss, MGM_loss = miga_forward(params, batch1, images, k_fwd, cfg)
    jax.block_until_ready((GIC_loss, GGIM_loss, MGM_loss))

    assert jnp.isfinite(GIC_loss) and jnp.isfinite(GGIM_loss) and jnp.isfinite(MGM_loss)
    print("KERNEL_OK")
</pallas_src>

<mosaic_0001>
module attributes {stable_mosaic.version = 11 : i64} {
  func.func @_gnn_kernel(%arg0: i32, %arg1: memref<1x12x32xf32, #tpu.memory_space<vmem>>, %arg2: memref<12x12xbf16, #tpu.memory_space<vmem>>, %arg3: memref<12x28xbf16, #tpu.memory_space<vmem>>, %arg4: memref<2x28x32xbf16, #tpu.memory_space<vmem>>, %arg5: memref<2x32x64xbf16, #tpu.memory_space<vmem>>, %arg6: memref<2x1x64xf32, #tpu.memory_space<vmem>>, %arg7: memref<2x64x32xbf16, #tpu.memory_space<vmem>>, %arg8: memref<2x1x32xf32, #tpu.memory_space<vmem>>, %arg9: memref<2x1x32xf32, #tpu.memory_space<vmem>>, %arg10: memref<2x1x32xf32, #tpu.memory_space<vmem>>, %arg11: memref<1x12x32xf32, #tpu.memory_space<vmem>>) attributes {dimension_semantics = [#tpu.dimension_semantics<parallel>], iteration_bounds = array<i64: 2>, scalar_prefetch = 0 : i64, scratch_operands = 0 : i64, tpu.core_type = #tpu.core_type<tc>, window_params = [{transform_indices = @transform_0, window_bounds = array<i64: 1, 12, 32>}, {pipeline_mode = #tpu.pipeline_mode<synchronous>, transform_indices = @transform_1, window_bounds = array<i64: 12, 12>}, {pipeline_mode = #tpu.pipeline_mode<synchronous>, transform_indices = @transform_2, window_bounds = array<i64: 12, 28>}, {pipeline_mode = #tpu.pipeline_mode<synchronous>, transform_indices = @transform_3, window_bounds = array<i64: 2, 28, 32>}, {pipeline_mode = #tpu.pipeline_mode<synchronous>, transform_indices = @transform_4, window_bounds = array<i64: 2, 32, 64>}, {pipeline_mode = #tpu.pipeline_mode<synchronous>, transform_indices = @transform_5, window_bounds = array<i64: 2, 1, 64>}, {pipeline_mode = #tpu.pipeline_mode<synchronous>, transform_indices = @transform_6, window_bounds = array<i64: 2, 64, 32>}, {pipeline_mode = #tpu.pipeline_mode<synchronous>, transform_indices = @transform_7, window_bounds = array<i64: 2, 1, 32>}, {pipeline_mode = #tpu.pipeline_mode<synchronous>, transform_indices = @transform_8, window_bounds = array<i64: 2, 1, 32>}, {pipeline_mode = #tpu.pipeline_mode<synchronous>, transform_indices = @transform_9, window_bounds = array<i64: 2, 1, 32>}, {transform_indices = @transform_10, window_bounds = array<i64: 1, 12, 32>}]} {
    %c0 = arith.constant 0 : index
    %c0_0 = arith.constant 0 : index
    %0 = vector.load %arg2[%c0, %c0_0] : memref<12x12xbf16, #tpu.memory_space<vmem>>, vector<12x12xbf16>
    %c0_1 = arith.constant 0 : index
    %c0_2 = arith.constant 0 : index
    %1 = vector.load %arg3[%c0_1, %c0_2] : memref<12x28xbf16, #tpu.memory_space<vmem>>, vector<12x28xbf16>
    %c0_3 = arith.constant 0 : index
    %c0_4 = arith.constant 0 : index
    %c0_5 = arith.constant 0 : index
    %2 = vector.load %arg1[%c0_3, %c0_4, %c0_5] : memref<1x12x32xf32, #tpu.memory_space<vmem>>, vector<1x12x32xf32>
    %3 = vector.shape_cast %2 : vector<1x12x32xf32> to vector<12x32xf32>
    %4 = arith.truncf %3 : vector<12x32xf32> to vector<12x32xbf16>
    %cst = arith.constant dense<0.000000e+00> : vector<12x32xf32>
    %5 = tpu.matmul %0, %4, %cst {dimension_numbers = #tpu.dot_dimension_numbers<[1], [0], [0], [1], [0, 0, 1, 1], [], []>} : vector<12x12xbf16>, vector<12x32xbf16>, vector<12x32xf32> -> vector<12x32xf32>
    %c0_6 = arith.constant 0 : index
    %c0_7 = arith.constant 0 : index
    %c0_8 = arith.constant 0 : index
    %6 = vector.load %arg4[%c0_6, %c0_7, %c0_8] : memref<2x28x32xbf16, #tpu.memory_space<vmem>>, vector<1x28x32xbf16>
    %7 = vector.shape_cast %6 : vector<1x28x32xbf16> to vector<28x32xbf16>
    %cst_9 = arith.constant dense<0.000000e+00> : vector<12x32xf32>
    %8 = tpu.matmul %1, %7, %cst_9 {dimension_numbers = #tpu.dot_dimension_numbers<[1], [0], [0], [1], [0, 0, 1, 1], [], []>} : vector<12x28xbf16>, vector<28x32xbf16>, vector<12x32xf32> -> vector<12x32xf32>
    %9 = arith.addf %5, %8 : vector<12x32xf32>
    %10 = arith.truncf %9 : vector<12x32xf32> to vector<12x32xbf16>
    %c0_10 = arith.constant 0 : index
    %c0_11 = arith.constant 0 : index
    %c0_12 = arith.constant 0 : index
    %11 = vector.load %arg5[%c0_10, %c0_11, %c0_12] : memref<2x32x64xbf16, #tpu.memory_space<vmem>>, vector<1x32x64xbf16>
    %12 = vector.shape_cast %11 : vector<1x32x64xbf16> to vector<32x64xbf16>
    %cst_13 = arith.constant dense<0.000000e+00> : vector<12x64xf32>
    %13 = tpu.matmul %10, %12, %cst_13 {dimension_numbers = #tpu.dot_dimension_numbers<[1], [0], [0], [1], [0, 0, 1, 1], [], []>} : vector<12x32xbf16>, vector<32x64xbf16>, vector<12x64xf32> -> vector<12x64xf32>
    %c0_14 = arith.constant 0 : index
    %c0_15 = arith.constant 0 : index
    %c0_16 = arith.constant 0 : index
    %14 = vector.load %arg6[%c0_14, %c0_15, %c0_16] : memref<2x1x64xf32, #tpu.memory_space<vmem>>, vector<1x1x64xf32>
    %15 = vector.shape_cast %14 : vector<1x1x64xf32> to vector<1x64xf32>
    %16 = vector.broadcast %15 : vector<1x64xf32> to vector<12x64xf32>
    %17 = arith.addf %13, %16 : vector<12x64xf32>
    %cst_17 = arith.constant 0.000000e+00 : f32
    %18 = vector.broadcast %cst_17 : f32 to vector<12x64xf32>
    %19 = arith.maximumf %17, %18 : vector<12x64xf32>
    %20 = arith.truncf %19 : vector<12x64xf32> to vector<12x64xbf16>
    %c0_18 = arith.constant 0 : index
    %c0_19 = arith.constant 0 : index
    %c0_20 = arith.constant 0 : index
    %21 = vector.load %arg7[%c0_18, %c0_19, %c0_20] : memref<2x64x32xbf16, #tpu.memory_space<vmem>>, vector<1x64x32xbf16>
    %22 = vector.shape_cast %21 : vector<1x64x32xbf16> to vector<64x32xbf16>
    %cst_21 = arith.constant dense<0.000000e+00> : vector<12x32xf32>
    %23 = tpu.matmul %20, %22, %cst_21 {dimension_numbers = #tpu.dot_dimension_numbers<[1], [0], [0], [1], [0, 0, 1, 1], [], []>} : vector<12x64xbf16>, vector<64x32xbf16>, vector<12x32xf32> -> vector<12x32xf32>
    %c0_22 = arith.constant 0 : index
    %c0_23 = arith.constant 0 : index
    %c0_24 = arith.constant 0 : index
    %24 = vector.load %arg8[%c0_22, %c0_23, %c0_24] : memref<2x1x32xf32, #tpu.memory_space<vmem>>, vector<1x1x32xf32>
    %25 = vector.shape_cast %24 : vector<1x1x32xf32> to vector<1x32xf32>
    %26 = vector.broadcast %25 : vector<1x32xf32> to vector<12x32xf32>
    %27 = arith.addf %23, %26 : vector<12x32xf32>
    %c0_25 = arith.constant 0 : index
    %c0_26 = arith.constant 0 : index
    %c0_27 = arith.constant 0 : index
    %28 = vector.load %arg9[%c0_25, %c0_26, %c0_27] : memref<2x1x32xf32, #tpu.memory_space<vmem>>, vector<1x1x32xf32>
    %29 = vector.shape_cast %28 : vector<1x1x32xf32> to vector<1x32xf32>
    %c0_28 = arith.constant 0 : index
    %c0_29 = arith.constant 0 : index
    %c0_30 = arith.constant 0 : index
    %30 = vector.load %arg10[%c0_28, %c0_29, %c0_30] : memref<2x1x32xf32, #tpu.memory_space<vmem>>, vector<1x1x32xf32>
    %31 = vector.shape_cast %30 : vector<1x1x32xf32> to vector<1x32xf32>
    %cst_31 = arith.constant dense<0.000000e+00> : vector<32xf32>
    %32 = vector.multi_reduction <add>, %27, %cst_31 [0] : vector<12x32xf32> to vector<32xf32>
    %33 = vector.shape_cast %32 : vector<32xf32> to vector<1x32xf32>
    %cst_32 = arith.constant 1.200000e+01 : f32
    %34 = vector.broadcast %cst_32 : f32 to vector<1x32xf32>
    %35 = arith.divf %33, %34 : vector<1x32xf32>
    %36 = vector.broadcast %35 : vector<1x32xf32> to vector<12x32xf32>
    %37 = arith.subf %27, %36 : vector<12x32xf32>
    %38 = arith.mulf %37, %37 : vector<12x32xf32>
    %cst_33 = arith.constant dense<0.000000e+00> : vector<32xf32>
    %39 = vector.multi_reduction <add>, %38, %cst_33 [0] : vector<12x32xf32> to vector<32xf32>
    %40 = vector.shape_cast %39 : vector<32xf32> to vector<1x32xf32>
    %cst_34 = arith.constant 1.200000e+01 : f32
    %41 = vector.broadcast %cst_34 : f32 to vector<1x32xf32>
    %42 = arith.divf %40, %41 : vector<1x32xf32>
    %cst_35 = arith.constant 9.99999974E-6 : f32
    %43 = vector.broadcast %cst_35 : f32 to vector<1x32xf32>
    %44 = arith.addf %42, %43 : vector<1x32xf32>
    %45 = math.rsqrt %44 : vector<1x32xf32>
    %46 = vector.broadcast %45 : vector<1x32xf32> to vector<12x32xf32>
    %47 = arith.mulf %37, %46 : vector<12x32xf32>
    %48 = vector.broadcast %29 : vector<1x32xf32> to vector<12x32xf32>
    %49 = arith.mulf %47, %48 : vector<12x32xf32>
    %50 = vector.broadcast %31 : vector<1x32xf32> to vector<12x32xf32>
    %51 = arith.addf %49, %50 : vector<12x32xf32>
    %cst_36 = arith.constant 0.000000e+00 : f32
    %52 = vector.broadcast %cst_36 : f32 to vector<12x32xf32>
    %53 = arith.maximumf %51, %52 : vector<12x32xf32>
    %54 = arith.truncf %53 : vector<12x32xf32> to vector<12x32xbf16>
    %cst_37 = arith.constant dense<0.000000e+00> : vector<12x32xf32>
    %55 = tpu.matmul %0, %54, %cst_37 {dimension_numbers = #tpu.dot_dimension_numbers<[1], [0], [0], [1], [0, 0, 1, 1], [], []>} : vector<12x12xbf16>, vector<12x32xbf16>, vector<12x32xf32> -> vector<12x32xf32>
    %c1 = arith.constant 1 : index
    %c0_38 = arith.constant 0 : index
    %c0_39 = arith.constant 0 : index
    %56 = vector.load %arg4[%c1, %c0_38, %c0_39] : memref<2x28x32xbf16, #tpu.memory_space<vmem>>, vector<1x28x32xbf16>
    %57 = vector.shape_cast %56 : vector<1x28x32xbf16> to vector<28x32xbf16>
    %cst_40 = arith.constant dense<0.000000e+00> : vector<12x32xf32>
    %58 = tpu.matmul %1, %57, %cst_40 {dimension_numbers = #tpu.dot_dimension_numbers<[1], [0], [0], [1], [0, 0, 1, 1], [], []>} : vector<12x28xbf16>, vector<28x32xbf16>, vector<12x32xf32> -> vector<12x32xf32>
    %59 = arith.addf %55, %58 : vector<12x32xf32>
    %60 = arith.truncf %59 : vector<12x32xf32> to vector<12x32xbf16>
    %c1_41 = arith.constant 1 : index
    %c0_42 = arith.constant 0 : index
    %c0_43 = arith.constant 0 : index
    %61 = vector.load %arg5[%c1_41, %c0_42, %c0_43] : memref<2x32x64xbf16, #tpu.memory_space<vmem>>, vector<1x32x64xbf16>
    %62 = vector.shape_cast %61 : vector<1x32x64xbf16> to vector<32x64xbf16>
    %cst_44 = arith.constant dense<0.000000e+00> : vector<12x64xf32>
    %63 = tpu.matmul %60, %62, %cst_44 {dimension_numbers = #tpu.dot_dimension_numbers<[1], [0], [0], [1], [0, 0, 1, 1], [], []>} : vector<12x32xbf16>, vector<32x64xbf16>, vector<12x64xf32> -> vector<12x64xf32>
    %c1_45 = arith.constant 1 : index
    %c0_46 = arith.constant 0 : index
    %c0_47 = arith.constant 0 : index
    %64 = vector.load %arg6[%c1_45, %c0_46, %c0_47] : memref<2x1x64xf32, #tpu.memory_space<vmem>>, vector<1x1x64xf32>
    %65 = vector.shape_cast %64 : vector<1x1x64xf32> to vector<1x64xf32>
    %66 = vector.broadcast %65 : vector<1x64xf32> to vector<12x64xf32>
    %67 = arith.addf %63, %66 : vector<12x64xf32>
    %cst_48 = arith.constant 0.000000e+00 : f32
    %68 = vector.broadcast %cst_48 : f32 to vector<12x64xf32>
    %69 = arith.maximumf %67, %68 : vector<12x64xf32>
    %70 = arith.truncf %69 : vector<12x64xf32> to vector<12x64xbf16>
    %c1_49 = arith.constant 1 : index
    %c0_50 = arith.constant 0 : index
    %c0_51 = arith.constant 0 : index
    %71 = vector.load %arg7[%c1_49, %c0_50, %c0_51] : memref<2x64x32xbf16, #tpu.memory_space<vmem>>, vector<1x64x32xbf16>
    %72 = vector.shape_cast %71 : vector<1x64x32xbf16> to vector<64x32xbf16>
    %cst_52 = arith.constant dense<0.000000e+00> : vector<12x32xf32>
    %73 = tpu.matmul %70, %72, %cst_52 {dimension_numbers = #tpu.dot_dimension_numbers<[1], [0], [0], [1], [0, 0, 1, 1], [], []>} : vector<12x64xbf16>, vector<64x32xbf16>, vector<12x32xf32> -> vector<12x32xf32>
    %c1_53 = arith.constant 1 : index
    %c0_54 = arith.constant 0 : index
    %c0_55 = arith.constant 0 : index
    %74 = vector.load %arg8[%c1_53, %c0_54, %c0_55] : memref<2x1x32xf32, #tpu.memory_space<vmem>>, vector<1x1x32xf32>
    %75 = vector.shape_cast %74 : vector<1x1x32xf32> to vector<1x32xf32>
    %76 = vector.broadcast %75 : vector<1x32xf32> to vector<12x32xf32>
    %77 = arith.addf %73, %76 : vector<12x32xf32>
    %c1_56 = arith.constant 1 : index
    %c0_57 = arith.constant 0 : index
    %c0_58 = arith.constant 0 : index
    %78 = vector.load %arg9[%c1_56, %c0_57, %c0_58] : memref<2x1x32xf32, #tpu.memory_space<vmem>>, vector<1x1x32xf32>
    %79 = vector.shape_cast %78 : vector<1x1x32xf32> to vector<1x32xf32>
    %c1_59 = arith.constant 1 : index
    %c0_60 = arith.constant 0 : index
    %c0_61 = arith.constant 0 : index
    %80 = vector.load %arg10[%c1_59, %c0_60, %c0_61] : memref<2x1x32xf32, #tpu.memory_space<vmem>>, vector<1x1x32xf32>
    %81 = vector.shape_cast %80 : vector<1x1x32xf32> to vector<1x32xf32>
    %cst_62 = arith.constant dense<0.000000e+00> : vector<32xf32>
    %82 = vector.multi_reduction <add>, %77, %cst_62 [0] : vector<12x32xf32> to vector<32xf32>
    %83 = vector.shape_cast %82 : vector<32xf32> to vector<1x32xf32>
    %cst_63 = arith.constant 1.200000e+01 : f32
    %84 = vector.broadcast %cst_63 : f32 to vector<1x32xf32>
    %85 = arith.divf %83, %84 : vector<1x32xf32>
    %86 = vector.broadcast %85 : vector<1x32xf32> to vector<12x32xf32>
    %87 = arith.subf %77, %86 : vector<12x32xf32>
    %88 = arith.mulf %87, %87 : vector<12x32xf32>
    %cst_64 = arith.constant dense<0.000000e+00> : vector<32xf32>
    %89 = vector.multi_reduction <add>, %88, %cst_64 [0] : vector<12x32xf32> to vector<32xf32>
    %90 = vector.shape_cast %89 : vector<32xf32> to vector<1x32xf32>
    %cst_65 = arith.constant 1.200000e+01 : f32
    %91 = vector.broadcast %cst_65 : f32 to vector<1x32xf32>
    %92 = arith.divf %90, %91 : vector<1x32xf32>
    %cst_66 = arith.constant 9.99999974E-6 : f32
    %93 = vector.broadcast %cst_66 : f32 to vector<1x32xf32>
    %94 = arith.addf %92, %93 : vector<1x32xf32>
    %95 = math.rsqrt %94 : vector<1x32xf32>
    %96 = vector.broadcast %95 : vector<1x32xf32> to vector<12x32xf32>
    %97 = arith.mulf %87, %96 : vector<12x32xf32>
    %98 = vector.broadcast %79 : vector<1x32xf32> to vector<12x32xf32>
    %99 = arith.mulf %97, %98 : vector<12x32xf32>
    %100 = vector.broadcast %81 : vector<1x32xf32> to vector<12x32xf32>
    %101 = arith.addf %99, %100 : vector<12x32xf32>
    %c0_67 = arith.constant 0 : index
    %c0_68 = arith.constant 0 : index
    %c0_69 = arith.constant 0 : index
    %102 = vector.load %arg11[%c0_67, %c0_68, %c0_69] : memref<1x12x32xf32, #tpu.memory_space<vmem>>, vector<1x12x32xf32>
    %103 = vector.shape_cast %102 : vector<1x12x32xf32> to vector<12x32xf32>
    %104 = vector.shape_cast %101 : vector<12x32xf32> to vector<1x12x32xf32>
    tpu.vector_store %arg11[%c0_67, %c0_68, %c0_69], %104 {strides = array<i32>} : memref<1x12x32xf32, #tpu.memory_space<vmem>>, vector<1x12x32xf32>,
    return
  }
  func.func @transform_0(%arg0: i32) -> (i32, i32, i32) {
    %c0_i32 = arith.constant 0 : i32
    %c0_i32_0 = arith.constant 0 : i32
    %c0_i32_1 = arith.constant 0 : i32
    return %arg0, %c0_i32, %c0_i32_0 : i32, i32, i32
  }
  func.func @transform_1(%arg0: i32) -> (i32, i32) {
    %c0_i32 = arith.constant 0 : i32
    %c0_i32_0 = arith.constant 0 : i32
    %c0_i32_1 = arith.constant 0 : i32
    return %c0_i32, %c0_i32_0 : i32, i32
  }
  func.func @transform_2(%arg0: i32) -> (i32, i32) {
    %c0_i32 = arith.constant 0 : i32
    %c0_i32_0 = arith.constant 0 : i32
    %c0_i32_1 = arith.constant 0 : i32
    return %c0_i32, %c0_i32_0 : i32, i32
  }
  func.func @transform_3(%arg0: i32) -> (i32, i32, i32) {
    %c0_i32 = arith.constant 0 : i32
    %c0_i32_0 = arith.constant 0 : i32
    %c0_i32_1 = arith.constant 0 : i32
    %c0_i32_2 = arith.constant 0 : i32
    return %c0_i32, %c0_i32_0, %c0_i32_1 : i32, i32, i32
  }
  func.func @transform_4(%arg0: i32) -> (i32, i32, i32) {
    %c0_i32 = arith.constant 0 : i32
    %c0_i32_0 = arith.constant 0 : i32
    %c0_i32_1 = arith.constant 0 : i32
    %c0_i32_2 = arith.constant 0 : i32
    return %c0_i32, %c0_i32_0, %c0_i32_1 : i32, i32, i32
  }
  func.func @transform_5(%arg0: i32) -> (i32, i32, i32) {
    %c0_i32 = arith.constant 0 : i32
    %c0_i32_0 = arith.constant 0 : i32
    %c0_i32_1 = arith.constant 0 : i32
    %c0_i32_2 = arith.constant 0 : i32
    return %c0_i32, %c0_i32_0, %c0_i32_1 : i32, i32, i32
  }
  func.func @transform_6(%arg0: i32) -> (i32, i32, i32) {
    %c0_i32 = arith.constant 0 : i32
    %c0_i32_0 = arith.constant 0 : i32
    %c0_i32_1 = arith.constant 0 : i32
    %c0_i32_2 = arith.constant 0 : i32
    return %c0_i32, %c0_i32_0, %c0_i32_1 : i32, i32, i32
  }
  func.func @transform_7(%arg0: i32) -> (i32, i32, i32) {
    %c0_i32 = arith.constant 0 : i32
    %c0_i32_0 = arith.constant 0 : i32
    %c0_i32_1 = arith.constant 0 : i32
    %c0_i32_2 = arith.constant 0 : i32
    return %c0_i32, %c0_i32_0, %c0_i32_1 : i32, i32, i32
  }
  func.func @transform_8(%arg0: i32) -> (i32, i32, i32) {
    %c0_i32 = arith.constant 0 : i32
    %c0_i32_0 = arith.constant 0 : i32
    %c0_i32_1 = arith.constant 0 : i32
    %c0_i32_2 = arith.constant 0 : i32
    return %c0_i32, %c0_i32_0, %c0_i32_1 : i32, i32, i32
  }
  func.func @transform_9(%arg0: i32) -> (i32, i32, i32) {
    %c0_i32 = arith.constant 0 : i32
    %c0_i32_0 = arith.constant 0 : i32
    %c0_i32_1 = arith.constant 0 : i32
    %c0_i32_2 = arith.constant 0 : i32
    return %c0_i32, %c0_i32_0, %c0_i32_1 : i32, i32, i32
  }
  func.func @transform_10(%arg0: i32) -> (i32, i32, i32) {
    %c0_i32 = arith.constant 0 : i32
    %c0_i32_0 = arith.constant 0 : i32
    %c0_i32_1 = arith.constant 0 : i32
    return %arg0, %c0_i32, %c0_i32_0 : i32, i32, i32
  }
}

</mosaic_0001>

<bundles_post_ra>
// kernel: tpu_custom_call.1
= control target key start
LH: loop header
LB: loop body
LE: loop exit
PB: predicated region body
PF: predicated region fallthrough
CT: control target
= control target key end

     0   :  { %s1322_s13 = smov 0   ;;  %s1488_s0 = inlined_call_operand.vmem [shape: f32[2,12,32], index: 0, kind: input, shape index: {}]   ;;  %s1489_s1 = inlined_call_operand.vmem [shape: bf16[12,12], index: 1, kind: input, shape index: {}]   ;;  %s1490_s2 = inlined_call_operand.vmem [shape: bf16[12,28], index: 2, kind: input, shape index: {}]   ;;  %s1491_s3 = inlined_call_operand.vmem [shape: bf16[2,28,32], index: 3, kind: input, shape index: {}]   ;;  %s1492_s4 = inlined_call_operand.vmem [shape: bf16[2,32,64], index: 4, kind: input, shape index: {}]   ;;  %s1493_s5 = inlined_call_operand.vmem [shape: f32[2,1,64], index: 5, kind: input, shape index: {}]   ;;  %s1494_s6 = inlined_call_operand.vmem [shape: bf16[2,64,32], index: 6, kind: input, shape index: {}]   ;;  %s1495_s7 = inlined_call_operand.vmem [shape: f32[2,1,32], index: 7, kind: input, shape index: {}]   ;;  %s1496_s8 = inlined_call_operand.vmem [shape: f32[2,1,32], index: 8, kind: input, shape index: {}]   ;;  %s1497_s9 = inlined_call_operand.vmem [shape: f32[2,1,32], index: 9, kind: input, shape index: {}]   ;;  %s1498_s10 = inlined_call_operand.vmem [shape: f32[2,12,32], index: 10, kind: output, shape index: {}]  }
   0x1 LB: > { %s1064_s14 = sadd.s32 4294967295, %s1263_s13   ;;  %p1068_p0 = scmp.ge.s32.totalorder %s1263_s13, 1  ;;  %s1263_s13 = sphi %s1322_s13, %s20_s13  }
   0x2   : > { %p312_p1 = scmp.lt.s32.totalorder %s1263_s13, 3 }
   0x4   : > { %p313_p2 = pnand %p1068_p0, %p312_p1 }
   0x5   : > { %p350_p3 = scmp.lt.s32.totalorder (!%p313_p2), %s1064_s14, 1 }
   0x6   : > { %316 = sbr.rel (%p313_p2) target bundleno = 1365 (0x555), region = 60 }
   0xb   : > { %vm392_vm0 = vcmask 1045504   ;;  %v1265_v0 = vmov 0.0   ;;  %v1235_v1 = vld [vmem:[%s1491_s3 + $0x8] sm:$0x3f]   ;;  %vm1266_vm1 = vmmov 0   ;;  %v1236_v3 = vld [vmem:[%s1491_s3] sm:$0xff]  }
   0xc   : > { %1157 = vmatprep.subr.bf16.mxu0 %v1265_v0  ;;  %1171 = vmatprep.subr.bf16.mxu1 %v1265_v0  ;;  %v394_v2 = vsel %vm392_vm0, %v1235_v1, 0  ;;  %v1347_v4 = vld [vmem:[%s1490_s2] sm:$0x3f]   ;;  %s1500_s14 = smov (!%p350_p3, %s1064_s14), 1  ;;  %vm388_vm2 = vcmask 228352   ;;  %vm442_vm3 = vcmask 97280  }
   0xd   : > { %1161 = vmatprep.mubr.msk.bf16.mxu0 %vm1266_vm1, %v1265_v0  ;;  %1175 = vmatprep.mubr.msk.bf16.mxu1 %vm1266_vm1, %v1265_v0  ;;  %s1129_s21 = sshll.u32 %s1500_s14, 4  ;;  %v1366_v9 = vld [vmem:[%s1489_s1] sm:$0x3f]   ;;  %v1239_v10 = vld [vmem:[%s1492_s4 + $0x8] sm:$0xff]   ;;  %v1241_v12 = vld [vmem:[%s1494_s6 + $0x18] sm:$0xff]   ;;  %vm514_vm4 = vcmask 261120  }
   0xe   : > { %1158 = vmatpush3.bf16.msra.mxu0 %v394_v2  ;;  %s354_s24 = scalar_lea.vmem %s1488_s0, %s1129_s21  ;;  %1172 = vmatpush3.bf16.msra.mxu1 %v1239_v10  ;;  %v1240_v11 = vld [vmem:[%s1492_s4] sm:$0xff]   ;;  %v1242_v24 = vld [vmem:[%s1494_s6 + $0x10] sm:$0xff]   ;;  %v1243_v25 = vld [vmem:[%s1494_s6 + $0x8] sm:$0xff]   ;;  %vm601_vm5 = vcmask 523264   ;;  %vm649_vm6 = vcmask 257024   ;;  %s359_s22 = scalar_lea.vmem %s1498_s10, %s1129_s21 }
   0xf   : > { %1159 = vmatprep.subr.bf16.mxu0 %v1265_v0  ;;  %v365_v5 = vld [vmem:[%s354_s24] sm:$0xff]  ;;  %v366_v6 = vld [vmem:[%s354_s24 + $0x8] sm:$0xf]  ;;  %1173 = vmatprep.subr.bf16.mxu1 %v1265_v0  ;;  %v1245_v37 = vld [vmem:[%s1491_s3 + $0x18] sm:$0x3f]  }
  0x10   : > { %v367_v7 = vpack.c.bf16 %v366_v6, %v365_v5  ;;  %v1244_v26 = vld [vmem:[%s1494_s6] sm:$0xff]   ;;  %v714_v38 = vsel %vm392_vm0, %v1245_v37, 0  ;;  %v1246_v39 = vld [vmem:[%s1491_s3 + $0x10] sm:$0xff]   ;;  %v1251_v37 = vld [vmem:[%s1494_s6 + $0x28] sm:$0xff]  }
  0x11   : > { %v1079_v27 = vld [vmem:[%s1493_s5] ss:$0 sm:$0xff] }
  0x12   : > { %1160 = vmatpush3.bf16.msra.mxu0 %v1236_v3  ;;  %v447_v8 = vsel %vm392_vm0, %v367_v7, 0  ;;  %1174 = vmatpush3.bf16.msra.mxu1 %v1240_v11  ;;  %v1083_v40 = vld [vmem:[%s1495_s7] ss:$0 sm:$0xff] }
  0x13   : > { %1165 = vmatprep.subr.bf16.mxu0 %v1265_v0  ;;  %1191 = vmatprep.subr.bf16.mxu1 %v1265_v0  ;;  %v1089_v11 = vld [vmem:[%s1496_s8] ss:$0 sm:$0xff] }
  0x15   : > { %1162 = vmatmul.mubr.msk.bf16.vlgmr.msra.gmra.mxu0 %vm388_vm2, %v1347_v4 }
  0x16   : > { %1167 = vmatprep.mubr.msk.bf16.mxu0 %vm1266_vm1, %v1265_v0  ;;  %1166 = vmatpush3.bf16.msra.mxu0 %v447_v8 }
  0x17   : > { %1179 = vmatprep.subr.bf16.mxu0 %v1265_v0 }
  0x1d   : > { %1168 = vmatmul.mubr.msk.bf16.vlgmr.msra.gmra.mxu0 %vm442_vm3, %v1366_v9 }
  0x1e   : > { %1187 = vmatprep.mubr.msk.bf16.mxu0 %vm1266_vm1, %v1265_v0  ;;  %1180 = vmatpush3.bf16.msra.mxu0 %v1241_v12 }
  0x1f   : > { %1181 = vmatprep.subr.bf16.mxu0 %v1265_v0 }
  0x22   : > { %1182 = vmatpush3.bf16.msra.mxu0 %v1242_v24 }
  0x23   : > { %1183 = vmatprep.subr.bf16.mxu0 %v1265_v0 }
  0x26   : > { %1184 = vmatpush3.bf16.msra.mxu0 %v1243_v25 }
  0x27   : > { %1185 = vmatprep.subr.bf16.mxu0 %v1265_v0 }
  0x2a   : > { %1186 = vmatpush3.bf16.msra.mxu0 %v1244_v26 }
  0x2b   : > { %1205 = vmatprep.subr.bf16.mxu0 %v1265_v0 }
  0xd5   : > { %v430_v13 = vpop.f32.mrf.mxu0 }
  0xd7   : > { %v1163_v14 = vpop.f32.mrf.mxu0 }
  0xd8   : > { %v1090_v14 = vld [vmem:[%s1497_s9] ss:$0 sm:$0xff] }
  0xd9   : > { %v433_v15 = vpop.f32.mrf.mxu0 }
  0xdb   : > { %v1164_v16 = vpop.f32.mrf.mxu0 }
  0xdd   : > { %v483_v17 = vpop.f32.mrf.mxu0 }
  0xde   : > { %v484_v20 = vadd.f32 %v483_v17, %v430_v13 }
  0xdf   : > { %v1169_v18 = vpop.f32.mrf.mxu0 }
  0xe1   : > { %v486_v19 = vpop.f32.mrf.mxu0 }
  0xe2   : > { %v487_v21 = vadd.f32 %v486_v19, %v433_v15 }
  0xe3   : > { %v1170_v22 = vpop.f32.mrf.mxu0 }
  0xe4   : > { %v490_v23 = vpack.c.bf16 %v487_v21, %v484_v20 }
  0xe6   : > { %1176 = vmatmul.mubr.msk.bf16.vlgmr.msra.gmra.mxu1 %vm514_vm4, %v490_v23 }
  0xe7   : > { %1195 = vmatprep.mubr.msk.bf16.mxu1 %vm1266_vm1, %v1265_v0  ;;  %1192 = vmatpush3.bf16.msra.mxu1 %v714_v38  ;;  %v1252_v38 = vld [vmem:[%s1494_s6 + $0x20] sm:$0xff]  }
  0xe8   : > { %1193 = vmatprep.subr.bf16.mxu1 %v1265_v0 }
  0xeb   : > { %1194 = vmatpush3.bf16.msra.mxu1 %v1246_v39  ;;  %v1104_v39 = vld [vmem:[%s1493_s5 + $0x1] ss:$0 sm:$0xff] }
  0xec   : > { %1199 = vmatprep.subr.bf16.mxu1 %v1265_v0 }
  0xee   : > { %1196 = vmatmul.mubr.msk.bf16.vlgmr.msra.gmra.mxu1 %vm388_vm2, %v1347_v4 }
  0xef   : > { %1201 = vmatprep.mubr.msk.bf16.mxu1 %vm1266_vm1, %v1265_v0 }
 0x1a6   : > { %v552_v28 = vpop.f32.mrf.mxu1 }
 0x1a7   : > { %v553_v30 = vadd.f32 %v1079_v27, %v552_v28  ;;  %v1248_v28 = vld [vmem:[%s1492_s4 + $0x10] sm:$0xff]  }
 0x1a8   : > { %v1177_v29 = vpop.f32.mrf.mxu1 }
 0x1a9   : > { %v559_v34 = vmax.f32 %v553_v30, 0.0 }
 0x1aa   : > { %v555_v31 = vpop.f32.mrf.mxu1 }
 0x1ab   : > { %v556_v32 = vadd.f32 %v1079_v27, %v555_v31  ;;  %v1247_v27 = vld [vmem:[%s1492_s4 + $0x18] sm:$0xff]  }
 0x1ac   : > { %v1178_v33 = vpop.f32.mrf.mxu1 }
 0x1ad   : > { %v560_v35 = vmax.f32 %v556_v32, 0.0 }
 0x1ae   : > { %v750_v23 = vpop.f32.mrf.mxu1 }
 0x1af   : > { %v561_v36 = vpack.c.bf16 %v560_v35, %v559_v34 }
 0x1b0   : > { %v1197_v24 = vpop.f32.mrf.mxu1 }
 0x1b1   : > { %1188 = vmatmul.mubr.msk.bf16.vlgmr.msra.gmra.mxu0 %vm601_vm5, %v561_v36  ;;  %v1250_v36 = vld [vmem:[%s1494_s6 + $0x30] sm:$0xff]  }
 0x1b2   : > { %1209 = vmatprep.mubr.msk.bf16.mxu0 %vm1266_vm1, %v1265_v0  ;;  %v753_v25 = vpop.f32.mrf.mxu1  ;;  %1206 = vmatpush3.bf16.msra.mxu0 %v1247_v27 }
 0x1b3   : > { %1207 = vmatprep.subr.bf16.mxu0 %v1265_v0 }
 0x1b4   : > { %v1198_v26 = vpop.f32.mrf.mxu1 }
 0x1b6   : > { %1208 = vmatpush3.bf16.msra.mxu0 %v1248_v28 }
 0x271   : > { %v639_v41 = vpop.f32.mrf.mxu0 }
 0x272   : > { %v640_v43 = vadd.f32 %v1083_v40, %v639_v41 }
 0x273   : > { %v1189_v42 = vpop.f32.mrf.mxu0 }
 0x274   : > { %v648_v47 = vsel %vm514_vm4, %v640_v43, 0.0 }
 0x275   : > { %v642_v44 = vpop.f32.mrf.mxu0 }
 0x276   : > { %v643_v45 = vadd.f32 %v1083_v40, %v642_v44 }
 0x277   : > { %v1190_v46 = vpop.f32.mrf.mxu0 }
 0x278   : > { %v650_v48 = vsel %vm649_vm6, %v643_v45, 0.0 }
 0x279   : > { %v651_v49 = vadd.f32 %v650_v48, %v648_v47 }
 0x27b   : > { %v652_v50 = vrot.slane %v651_v49, 4 }
 0x27d   : > { %v653_v51 = vadd.f32 %v652_v50, %v651_v49 }
 0x27f   : > { %v654_v52 = vrot.slane %v653_v51, 2 }
 0x281   : > { %v655_v53 = vadd.f32 %v654_v52, %v653_v51 }
 0x283   : > { %v656_v54 = vrot.slane %v655_v53, 1 }
 0x285   : > { %v657_v55 = vadd.f32 %v656_v54, %v655_v53 }
 0x287   : > { %v659_v56 = vmul.f32 0.083333336, %v657_v55 }
 0x289   : > { %v660_v57 = vsub.f32 %v640_v43, %v659_v56  ;;  %v661_v58 = vsub.f32 %v643_v45, %v659_v56 }
 0x28b   : > { %v662_v59 = vmul.f32 %v660_v57, %v660_v57  ;;  %v663_v60 = vmul.f32 %v661_v58, %v661_v58 }
 0x28d   : > { %v664_v61 = vsel %vm514_vm4, %v662_v59, 0.0  ;;  %v665_v62 = vsel %vm649_vm6, %v663_v60, 0.0 }
 0x28e   : > { %v666_v63 = vadd.f32 %v665_v62, %v664_v61 }
 0x290   : > { %v667_v1 = vrot.slane %v666_v63, 4 }
 0x292   : > { %v668_v2 = vadd.f32 %v667_v1, %v666_v63 }
 0x294   : > { %v669_v3 = vrot.slane %v668_v2, 2 }
 0x296   : > { %v670_v4 = vadd.f32 %v669_v3, %v668_v2 }
 0x298   : > { %v671_v5 = vrot.slane %v670_v4, 1 }
 0x29a   : > { %v672_v6 = vadd.f32 %v671_v5, %v670_v4 }
 0x29c   : > { %v673_v7 = vmul.f32 0.083333336, %v672_v6 }
 0x29e   : > { %v674_v8 = vadd.f32 1e-05, %v673_v7 }
 0x2a0   : > { %1253 = vrsqrt.f32 %v674_v8 }
 0x2ad   : > { %v1254_v10 = vpop.eup %1253 }
 0x2ae   : > { %v676_v12 = vmul.f32 %v1254_v10, %v660_v57  ;;  %v677_v13 = vmul.f32 %v1254_v10, %v661_v58 }
 0x2b0   : > { %v684_v15 = vmul.f32 %v1089_v11, %v676_v12  ;;  %v685_v16 = vmul.f32 %v1089_v11, %v677_v13 }
 0x2b2   : > { %v692_v17 = vadd.f32 %v1090_v14, %v684_v15  ;;  %v693_v18 = vadd.f32 %v1090_v14, %v685_v16 }
 0x2b4   : > { %v694_v19 = vmax.f32 %v692_v17, 0.0  ;;  %v695_v20 = vmax.f32 %v693_v18, 0.0 }
 0x2b6   : > { %v696_v21 = vpack.c.bf16 %v695_v20, %v694_v19  ;;  %v1125_v19 = vld [vmem:[%s1496_s8 + $0x1] ss:$0 sm:$0xff] }
 0x2b8   : > { %v758_v22 = vsel %vm392_vm0, %v696_v21, 0 }
 0x2b9   : > { %1200 = vmatpush3.bf16.msra.mxu1 %v758_v22  ;;  %v1126_v22 = vld [vmem:[%s1497_s9 + $0x1] ss:$0 sm:$0xff] }
 0x2ba   : > { %1213 = vmatprep.subr.bf16.mxu1 %v1265_v0 }
 0x2bc   : > { %1202 = vmatmul.mubr.msk.bf16.vlgmr.msra.gmra.mxu1 %vm442_vm3, %v1366_v9  ;;  %v1249_v9 = vld [vmem:[%s1494_s6 + $0x38] sm:$0xff]  }
 0x2bd   : > { %1221 = vmatprep.mubr.msk.bf16.mxu1 %vm1266_vm1, %v1265_v0  ;;  %1214 = vmatpush3.bf16.msra.mxu1 %v1249_v9 }
 0x2be   : > { %1215 = vmatprep.subr.bf16.mxu1 %v1265_v0 }
 0x2c1   : > { %1216 = vmatpush3.bf16.msra.mxu1 %v1250_v36 }
 0x2c2   : > { %1217 = vmatprep.subr.bf16.mxu1 %v1265_v0 }
 0x2c5   : > { %1218 = vmatpush3.bf16.msra.mxu1 %v1251_v37 }
 0x2c6   : > { %1219 = vmatprep.subr.bf16.mxu1 %v1265_v0  ;;  %v1117_v0 = vld [vmem:[%s1495_s7 + $0x1] ss:$0 sm:$0xff] }
 0x2c9   : > { %1220 = vmatpush3.bf16.msra.mxu1 %v1252_v38 }
 0x37c   : > { %v794_v29 = vpop.f32.mrf.mxu1 }
 0x37d   : > { %v795_v32 = vadd.f32 %v794_v29, %v750_v23 }
 0x37e   : > { %v1203_v30 = vpop.f32.mrf.mxu1 }
 0x380   : > { %v797_v31 = vpop.f32.mrf.mxu1 }
 0x381   : > { %v798_v33 = vadd.f32 %v797_v31, %v753_v25 }
 0x382   : > { %v1204_v34 = vpop.f32.mrf.mxu1 }
 0x383   : > { %v801_v35 = vpack.c.bf16 %v798_v33, %v795_v32 }
 0x385   : > { %1210 = vmatmul.mubr.msk.bf16.vlgmr.msra.gmra.mxu0 %vm514_vm4, %v801_v35 }
 0x445   : > { %v864_v40 = vpop.f32.mrf.mxu0 }
 0x446   : > { %v865_v42 = vadd.f32 %v1104_v39, %v864_v40 }
 0x447   : > { %v1211_v41 = vpop.f32.mrf.mxu0 }
 0x448   : > { %v871_v46 = vmax.f32 %v865_v42, 0.0 }
 0x449   : > { %v867_v43 = vpop.f32.mrf.mxu0 }
 0x44a   : > { %v868_v44 = vadd.f32 %v1104_v39, %v867_v43 }
 0x44b   : > { %v1212_v45 = vpop.f32.mrf.mxu0 }
 0x44c   : > { %v872_v47 = vmax.f32 %v868_v44, 0.0 }
 0x44e   : > { %v873_v48 = vpack.c.bf16 %v872_v47, %v871_v46 }
 0x450   : > { %1222 = vmatmul.mubr.msk.bf16.vlgmr.msra.gmra.mxu1 %vm601_vm5, %v873_v48 }
 0x510   : > { %v952_v49 = vpop.f32.mrf.mxu1 }
 0x511   : > { %v953_v51 = vadd.f32 %v1117_v0, %v952_v49 }
 0x512   : > { %v1223_v50 = vpop.f32.mrf.mxu1 }
 0x513   : > { %v963_v55 = vsel %vm514_vm4, %v953_v51, 0.0 }
 0x514   : > { %v955_v52 = vpop.f32.mrf.mxu1 }
 0x515   : > { %v956_v53 = vadd.f32 %v1117_v0, %v955_v52 }
 0x516   : > { %v1224_v54 = vpop.f32.mrf.mxu1 }
 0x517   : > { %v964_v56 = vsel %vm649_vm6, %v956_v53, 0.0 }
 0x518   : > { %v965_v57 = vadd.f32 %v964_v56, %v963_v55 }
 0x51a   : > { %v966_v58 = vrot.slane %v965_v57, 4 }
 0x51c   : > { %v967_v59 = vadd.f32 %v966_v58, %v965_v57 }
 0x51e   : > { %v968_v60 = vrot.slane %v967_v59, 2 }
 0x520   : > { %v969_v61 = vadd.f32 %v968_v60, %v967_v59 }
 0x522   : > { %v970_v62 = vrot.slane %v969_v61, 1 }
 0x524   : > { %v971_v63 = vadd.f32 %v970_v62, %v969_v61 }
 0x526   : > { %v972_v1 = vmul.f32 0.083333336, %v971_v63 }
 0x528   : > { %v973_v2 = vsub.f32 %v953_v51, %v972_v1  ;;  %v974_v3 = vsub.f32 %v956_v53, %v972_v1 }
 0x52a   : > { %v975_v4 = vmul.f32 %v973_v2, %v973_v2  ;;  %v976_v5 = vmul.f32 %v974_v3, %v974_v3 }
 0x52c   : > { %v977_v6 = vsel %vm514_vm4, %v975_v4, 0.0  ;;  %v978_v7 = vsel %vm649_vm6, %v976_v5, 0.0 }
 0x52d   : > { %v979_v8 = vadd.f32 %v978_v7, %v977_v6 }
 0x52f   : > { %v980_v10 = vrot.slane %v979_v8, 4 }
 0x531   : > { %v981_v11 = vadd.f32 %v980_v10, %v979_v8 }
 0x533   : > { %v982_v12 = vrot.slane %v981_v11, 2 }
 0x535   : > { %v983_v13 = vadd.f32 %v982_v12, %v981_v11 }
 0x537   : > { %v984_v14 = vrot.slane %v983_v13, 1 }
 0x539   : > { %v985_v15 = vadd.f32 %v984_v14, %v983_v13 }
 0x53b   : > { %v986_v16 = vmul.f32 0.083333336, %v985_v15 }
 0x53d   : > { %v987_v17 = vadd.f32 1e-05, %v986_v16 }
 0x53f   : > { %1255 = vrsqrt.f32 %v987_v17 }
 0x54c   : > { %v1256_v18 = vpop.eup %1255 }
 0x54d   : > { %v989_v20 = vmul.f32 %v1256_v18, %v973_v2  ;;  %v990_v21 = vmul.f32 %v1256_v18, %v974_v3 }
 0x54f   : > { %v997_v23 = vmul.f32 %v1125_v19, %v989_v20  ;;  %v998_v24 = vmul.f32 %v1125_v19, %v990_v21 }
 0x551   : > { %v1005_v25 = vadd.f32 %v1126_v22, %v997_v23  ;;  %v1006_v26 = vadd.f32 %v1126_v22, %v998_v24 }
 0x553   : > { %1007 = vst.msk [vmem:[%s359_s22] sm:$0xff] %vm514_vm4, %v1005_v25 }
 0x554   : > { %1008 = vst.msk [vmem:[%s359_s22 + $0x8] sm:$0xf] %vm649_vm6, %v1006_v26 }
 0x555 PF: > { %s20_s13 = sadd.s32 1, %s1263_s13  }
 0x556   : > { %p17_p4 = scmp.ge.s32.totalorder %s20_s13, 4  }
 0x558   :  { %19 = sbr.rel (!%p17_p4) target bundleno = 1 (0x1), region = 97 }

</bundles_post_ra>
